<compile_context>
chip_gen: v6e
topology: v6e:2x2x1
jax: 0.10.0
libtpu: 0.0.40
codegen_flags: <defaults>
</compile_context>

<pallas_src>
import jax
import jax.numpy as jnp
from jax.experimental import pallas as pl
from jax.experimental.pallas import tpu as pltpu


def residual_block_kernel(x_ref, w1_ref, w2_ref, b1_ref, b2_ref, out_ref,
                          pad1_ref, pad2_ref):
    # x_ref:    (1, H, W*C)    lane-dense input rows
    # w*_ref:   (3, W*C, W*C)  banded conv weights (BN scale folded), one per dy
    # b*_ref:   (1, W*C)       BN bias tiled per (w, c) lane
    # out_ref:  (1, H, W*C)
    # pad*_ref: (H+2, W*C)     row-padded staging buffers (VMEM scratch)
    _, H, WC = x_ref.shape
    f32 = jnp.float32
    zrow = jnp.zeros((1, WC), f32)

    x = x_ref[0]                                     # (H, W*C): conv1 input + residual

    # Row-padded staging for conv1's two halo-shifted taps (dy = 0, 2):
    # zero only the 2 halo rows + one aligned interior store.
    pad1_ref[0:1, :] = zrow
    pad1_ref[H + 1:H + 2, :] = zrow
    pad1_ref[1:1 + H, :] = x

    # conv1 (+ folded BN1 scale): 3 dense MXU matmuls, f32 accumulation.
    # Bias seeds the accumulator; the center tap reuses the register copy of x.
    acc = jnp.dot(x, w1_ref[1], preferred_element_type=f32) + b1_ref[...]
    acc = acc + jnp.dot(pad1_ref[0:H, :], w1_ref[0], preferred_element_type=f32)
    acc = acc + jnp.dot(pad1_ref[2:2 + H, :], w1_ref[2], preferred_element_type=f32)
    y1 = jnp.maximum(acc, 0.0)                       # BN1 bias already in acc; ReLU

    # Same staging trick for conv2's input (separate buffer avoids a WAR hazard
    # against the conv1 shifted loads; VMEM cost is negligible).
    pad2_ref[0:1, :] = zrow
    pad2_ref[H + 1:H + 2, :] = zrow
    pad2_ref[1:1 + H, :] = y1

    # conv2 (+ folded BN2 scale); BN2 bias + identity residual seed the accumulator.
    acc = jnp.dot(y1, w2_ref[1], preferred_element_type=f32) + (x + b2_ref[...])
    acc = acc + jnp.dot(pad2_ref[0:H, :], w2_ref[0], preferred_element_type=f32)
    acc = acc + jnp.dot(pad2_ref[2:2 + H, :], w2_ref[2], preferred_element_type=f32)

    out_ref[0] = jnp.maximum(acc, 0.0)               # full-width unmasked store


def _banded_weights(w_hwio_scaled, W):
    """(3,3,Cin,Cout) conv weights -> (3, W*Cin, W*Cout) banded matrices.

    B[dy, (w+dx-1)*Cin + ci, w*Cout + co] = w[dy, dx, ci, co]; out-of-range dx
    taps are dropped, which implements 'SAME' zero padding along W.
    """
    dt = w_hwio_scaled.dtype
    return jnp.stack([
        sum(jnp.kron(jnp.eye(W, k=1 - dx, dtype=dt), w_hwio_scaled[dy, dx])
            for dx in range(3))
        for dy in range(3)])


def residual_block(x_nhwc, w1_hwio, w2_hwio, bn1, bn2, eps=1e-5):
    """x_nhwc: (N,H,W,C); w*_hwio: (3,3,Cin,Cout); bn*: (gamma,beta,mean,var)."""
    g1, be1, m1, v1 = bn1
    g2, be2, m2, v2 = bn2
    s1 = g1 * jax.lax.rsqrt(v1 + eps)
    s2 = g2 * jax.lax.rsqrt(v2 + eps)
    b1 = be1 - m1 * s1
    b2 = be2 - m2 * s2

    N, H, W, Cin = x_nhwc.shape
    Cout = w1_hwio.shape[-1]
    assert Cin == Cout, "identity shortcut requires inchannel == outchannel"
    WC = W * Cout

    # Fold BN scales into the conv weights (free at trace time) and build the
    # banded per-dy matrices; tile the biases to the lane-dense (w, c) layout.
    B1 = _banded_weights(w1_hwio * s1, W)            # (3, WC, WC)
    B2 = _banded_weights(w2_hwio * s2, W)            # (3, WC, WC)
    b1t = jnp.tile(b1, W).reshape(1, WC)
    b2t = jnp.tile(b2, W).reshape(1, WC)

    x2d = x_nhwc.reshape(N, H, WC)                   # free: same memory layout

    out2d = pl.pallas_call(
        residual_block_kernel,
        out_shape=jax.ShapeDtypeStruct((N, H, WC), jnp.float32),
        grid=(N,),
        in_specs=[
            pl.BlockSpec((1, H, WC), lambda n: (n, 0, 0)),
            pl.BlockSpec((3, WC, WC), lambda n: (0, 0, 0)),   # grid-invariant: DMA'd once
            pl.BlockSpec((3, WC, WC), lambda n: (0, 0, 0)),
            pl.BlockSpec((1, WC), lambda n: (0, 0)),
            pl.BlockSpec((1, WC), lambda n: (0, 0)),
        ],
        out_specs=pl.BlockSpec((1, H, WC), lambda n: (n, 0, 0)),
        scratch_shapes=[
            pltpu.VMEM((H + 2, WC), jnp.float32),    # row-padded x
            pltpu.VMEM((H + 2, WC), jnp.float32),    # row-padded intermediate
        ],
        compiler_params=pltpu.CompilerParams(
            dimension_semantics=("parallel",),
            vmem_limit_bytes=32 * 1024 * 1024,
        ),
    )(x2d, B1, B2, b1t, b2t)

    return out2d.reshape(N, H, W, Cout)


def reference_forward(x_nhwc, w1_hwio, w2_hwio, bn1, bn2, eps=1e-5):
    dn = ('NHWC', 'HWIO', 'NHWC')
    hi = jax.lax.Precision.HIGHEST
    g1, be1, m1, v1 = bn1
    g2, be2, m2, v2 = bn2
    y = jax.lax.conv_general_dilated(x_nhwc, w1_hwio, (1, 1), 'SAME',
                                     dimension_numbers=dn, precision=hi)
    y = (y - m1) / jnp.sqrt(v1 + eps) * g1 + be1
    y = jnp.maximum(y, 0.0)
    y = jax.lax.conv_general_dilated(y, w2_hwio, (1, 1), 'SAME',
                                     dimension_numbers=dn, precision=hi)
    y = (y - m2) / jnp.sqrt(v2 + eps) * g2 + be2
    return jnp.maximum(y + x_nhwc, 0.0)


if __name__ == "__main__":
    # Small shapes consistent with the module: batch=2, inchannel=outchannel=8,
    # spatial=16, stride=1, shortcut=None (identity residual). W*C = 128 keeps
    # the flattened lane dimension exactly one vreg wide.
    N, C, H, W = 2, 8, 16, 16

    key = jax.random.PRNGKey(0)
    kx, kw1, kw2, kg1, kb1, km1, kv1, kg2, kb2, km2, kv2 = jax.random.split(key, 11)

    # PyTorch-style NCHW input, transposed to the kernel's NHWC layout.
    x_nchw = jax.random.normal(kx, (N, C, H, W), jnp.float32)
    x_nhwc = jnp.transpose(x_nchw, (0, 2, 3, 1))

    # Conv weights in HWIO.
    w1 = 0.1 * jax.random.normal(kw1, (3, 3, C, C), jnp.float32)
    w2 = 0.1 * jax.random.normal(kw2, (3, 3, C, C), jnp.float32)

    # BatchNorm parameters (eval-mode running stats), deterministic + nontrivial.
    bn1 = (1.0 + 0.1 * jax.random.normal(kg1, (C,), jnp.float32),
           0.1 * jax.random.normal(kb1, (C,), jnp.float32),
           0.05 * jax.random.normal(km1, (C,), jnp.float32),
           jax.random.uniform(kv1, (C,), jnp.float32, 0.5, 1.5))
    bn2 = (1.0 + 0.1 * jax.random.normal(kg2, (C,), jnp.float32),
           0.1 * jax.random.normal(kb2, (C,), jnp.float32),
           0.05 * jax.random.normal(km2, (C,), jnp.float32),
           jax.random.uniform(kv2, (C,), jnp.float32, 0.5, 1.5))

    out = residual_block(x_nhwc, w1, w2, bn1, bn2)
    out = jax.block_until_ready(out)

    ref = reference_forward(x_nhwc, w1, w2, bn1, bn2)
    assert out.shape == (N, H, W, C)
    assert jnp.allclose(out, ref, rtol=1e-4, atol=1e-4), "mismatch vs JAX reference"

    print("KERNEL_OK")
</pallas_src>

<mosaic_0001>
module attributes {stable_mosaic.version = 11 : i64} {
  func.func @residual_block_kernel(%arg0: i32, %arg1: memref<1x16x128xf32, #tpu.memory_space<vmem>>, %arg2: memref<3x128x128xf32, #tpu.memory_space<vmem>>, %arg3: memref<3x128x128xf32, #tpu.memory_space<vmem>>, %arg4: memref<1x128xf32, #tpu.memory_space<vmem>>, %arg5: memref<1x128xf32, #tpu.memory_space<vmem>>, %arg6: memref<1x16x128xf32, #tpu.memory_space<vmem>>, %arg7: memref<18x128xf32, #tpu.memory_space<vmem>>, %arg8: memref<18x128xf32, #tpu.memory_space<vmem>>) attributes {dimension_semantics = [#tpu.dimension_semantics<parallel>], iteration_bounds = array<i64: 2>, scalar_prefetch = 0 : i64, scratch_operands = 2 : i64, tpu.core_type = #tpu.core_type<tc>, window_params = [{transform_indices = @transform_0, window_bounds = array<i64: 1, 16, 128>}, {pipeline_mode = #tpu.pipeline_mode<synchronous>, transform_indices = @transform_1, window_bounds = array<i64: 3, 128, 128>}, {pipeline_mode = #tpu.pipeline_mode<synchronous>, transform_indices = @transform_2, window_bounds = array<i64: 3, 128, 128>}, {pipeline_mode = #tpu.pipeline_mode<synchronous>, transform_indices = @transform_3, window_bounds = array<i64: 1, 128>}, {pipeline_mode = #tpu.pipeline_mode<synchronous>, transform_indices = @transform_4, window_bounds = array<i64: 1, 128>}, {transform_indices = @transform_5, window_bounds = array<i64: 1, 16, 128>}]} {
    %cst = arith.constant 0.000000e+00 : f32
    %0 = vector.broadcast %cst : f32 to vector<1x128xf32>
    %c0 = arith.constant 0 : index
    %c0_0 = arith.constant 0 : index
    %c0_1 = arith.constant 0 : index
    %1 = vector.load %arg1[%c0, %c0_0, %c0_1] : memref<1x16x128xf32, #tpu.memory_space<vmem>>, vector<1x16x128xf32>
    %2 = vector.shape_cast %1 : vector<1x16x128xf32> to vector<16x128xf32>
    %c0_2 = arith.constant 0 : index
    %c0_3 = arith.constant 0 : index
    %3 = vector.load %arg7[%c0_2, %c0_3] : memref<18x128xf32, #tpu.memory_space<vmem>>, vector<1x128xf32>
    tpu.vector_store %arg7[%c0_2, %c0_3], %0 {strides = array<i32>} : memref<18x128xf32, #tpu.memory_space<vmem>>, vector<1x128xf32>,
    %c17 = arith.constant 17 : index
    %c0_4 = arith.constant 0 : index
    %4 = vector.load %arg7[%c17, %c0_4] : memref<18x128xf32, #tpu.memory_space<vmem>>, vector<1x128xf32>
    tpu.vector_store %arg7[%c17, %c0_4], %0 {strides = array<i32>} : memref<18x128xf32, #tpu.memory_space<vmem>>, vector<1x128xf32>,
    %c1 = arith.constant 1 : index
    %c0_5 = arith.constant 0 : index
    %5 = vector.load %arg7[%c1, %c0_5] : memref<18x128xf32, #tpu.memory_space<vmem>>, vector<16x128xf32>
    tpu.vector_store %arg7[%c1, %c0_5], %2 {strides = array<i32>} : memref<18x128xf32, #tpu.memory_space<vmem>>, vector<16x128xf32>,
    %c1_6 = arith.constant 1 : index
    %c0_7 = arith.constant 0 : index
    %c0_8 = arith.constant 0 : index
    %6 = vector.load %arg2[%c1_6, %c0_7, %c0_8] : memref<3x128x128xf32, #tpu.memory_space<vmem>>, vector<1x128x128xf32>
    %7 = vector.shape_cast %6 : vector<1x128x128xf32> to vector<128x128xf32>
    %cst_9 = arith.constant dense<0.000000e+00> : vector<16x128xf32>
    %8 = tpu.matmul %2, %7, %cst_9 {dimension_numbers = #tpu.dot_dimension_numbers<[1], [0], [0], [1], [0, 0, 1, 1], [], []>} : vector<16x128xf32>, vector<128x128xf32>, vector<16x128xf32> -> vector<16x128xf32>
    %c0_10 = arith.constant 0 : index
    %c0_11 = arith.constant 0 : index
    %9 = vector.load %arg4[%c0_10, %c0_11] : memref<1x128xf32, #tpu.memory_space<vmem>>, vector<1x128xf32>
    %10 = vector.broadcast %9 : vector<1x128xf32> to vector<16x128xf32>
    %11 = arith.addf %8, %10 : vector<16x128xf32>
    %c0_12 = arith.constant 0 : index
    %c0_13 = arith.constant 0 : index
    %12 = vector.load %arg7[%c0_12, %c0_13] : memref<18x128xf32, #tpu.memory_space<vmem>>, vector<16x128xf32>
    %c0_14 = arith.constant 0 : index
    %c0_15 = arith.constant 0 : index
    %c0_16 = arith.constant 0 : index
    %13 = vector.load %arg2[%c0_14, %c0_15, %c0_16] : memref<3x128x128xf32, #tpu.memory_space<vmem>>, vector<1x128x128xf32>
    %14 = vector.shape_cast %13 : vector<1x128x128xf32> to vector<128x128xf32>
    %cst_17 = arith.constant dense<0.000000e+00> : vector<16x128xf32>
    %15 = tpu.matmul %12, %14, %cst_17 {dimension_numbers = #tpu.dot_dimension_numbers<[1], [0], [0], [1], [0, 0, 1, 1], [], []>} : vector<16x128xf32>, vector<128x128xf32>, vector<16x128xf32> -> vector<16x128xf32>
    %16 = arith.addf %11, %15 : vector<16x128xf32>
    %c2 = arith.constant 2 : index
    %c0_18 = arith.constant 0 : index
    %17 = vector.load %arg7[%c2, %c0_18] : memref<18x128xf32, #tpu.memory_space<vmem>>, vector<16x128xf32>
    %c2_19 = arith.constant 2 : index
    %c0_20 = arith.constant 0 : index
    %c0_21 = arith.constant 0 : index
    %18 = vector.load %arg2[%c2_19, %c0_20, %c0_21] : memref<3x128x128xf32, #tpu.memory_space<vmem>>, vector<1x128x128xf32>
    %19 = vector.shape_cast %18 : vector<1x128x128xf32> to vector<128x128xf32>
    %cst_22 = arith.constant dense<0.000000e+00> : vector<16x128xf32>
    %20 = tpu.matmul %17, %19, %cst_22 {dimension_numbers = #tpu.dot_dimension_numbers<[1], [0], [0], [1], [0, 0, 1, 1], [], []>} : vector<16x128xf32>, vector<128x128xf32>, vector<16x128xf32> -> vector<16x128xf32>
    %21 = arith.addf %16, %20 : vector<16x128xf32>
    %cst_23 = arith.constant 0.000000e+00 : f32
    %22 = vector.broadcast %cst_23 : f32 to vector<16x128xf32>
    %23 = arith.maximumf %21, %22 : vector<16x128xf32>
    %c0_24 = arith.constant 0 : index
    %c0_25 = arith.constant 0 : index
    %24 = vector.load %arg8[%c0_24, %c0_25] : memref<18x128xf32, #tpu.memory_space<vmem>>, vector<1x128xf32>
    tpu.vector_store %arg8[%c0_24, %c0_25], %0 {strides = array<i32>} : memref<18x128xf32, #tpu.memory_space<vmem>>, vector<1x128xf32>,
    %c17_26 = arith.constant 17 : index
    %c0_27 = arith.constant 0 : index
    %25 = vector.load %arg8[%c17_26, %c0_27] : memref<18x128xf32, #tpu.memory_space<vmem>>, vector<1x128xf32>
    tpu.vector_store %arg8[%c17_26, %c0_27], %0 {strides = array<i32>} : memref<18x128xf32, #tpu.memory_space<vmem>>, vector<1x128xf32>,
    %c1_28 = arith.constant 1 : index
    %c0_29 = arith.constant 0 : index
    %26 = vector.load %arg8[%c1_28, %c0_29] : memref<18x128xf32, #tpu.memory_space<vmem>>, vector<16x128xf32>
    tpu.vector_store %arg8[%c1_28, %c0_29], %23 {strides = array<i32>} : memref<18x128xf32, #tpu.memory_space<vmem>>, vector<16x128xf32>,
    %c1_30 = arith.constant 1 : index
    %c0_31 = arith.constant 0 : index
    %c0_32 = arith.constant 0 : index
    %27 = vector.load %arg3[%c1_30, %c0_31, %c0_32] : memref<3x128x128xf32, #tpu.memory_space<vmem>>, vector<1x128x128xf32>
    %28 = vector.shape_cast %27 : vector<1x128x128xf32> to vector<128x128xf32>
    %cst_33 = arith.constant dense<0.000000e+00> : vector<16x128xf32>
    %29 = tpu.matmul %23, %28, %cst_33 {dimension_numbers = #tpu.dot_dimension_numbers<[1], [0], [0], [1], [0, 0, 1, 1], [], []>} : vector<16x128xf32>, vector<128x128xf32>, vector<16x128xf32> -> vector<16x128xf32>
    %c0_34 = arith.constant 0 : index
    %c0_35 = arith.constant 0 : index
    %30 = vector.load %arg5[%c0_34, %c0_35] : memref<1x128xf32, #tpu.memory_space<vmem>>, vector<1x128xf32>
    %31 = vector.broadcast %30 : vector<1x128xf32> to vector<16x128xf32>
    %32 = arith.addf %2, %31 : vector<16x128xf32>
    %33 = arith.addf %29, %32 : vector<16x128xf32>
    %c0_36 = arith.constant 0 : index
    %c0_37 = arith.constant 0 : index
    %34 = vector.load %arg8[%c0_36, %c0_37] : memref<18x128xf32, #tpu.memory_space<vmem>>, vector<16x128xf32>
    %c0_38 = arith.constant 0 : index
    %c0_39 = arith.constant 0 : index
    %c0_40 = arith.constant 0 : index
    %35 = vector.load %arg3[%c0_38, %c0_39, %c0_40] : memref<3x128x128xf32, #tpu.memory_space<vmem>>, vector<1x128x128xf32>
    %36 = vector.shape_cast %35 : vector<1x128x128xf32> to vector<128x128xf32>
    %cst_41 = arith.constant dense<0.000000e+00> : vector<16x128xf32>
    %37 = tpu.matmul %34, %36, %cst_41 {dimension_numbers = #tpu.dot_dimension_numbers<[1], [0], [0], [1], [0, 0, 1, 1], [], []>} : vector<16x128xf32>, vector<128x128xf32>, vector<16x128xf32> -> vector<16x128xf32>
    %38 = arith.addf %33, %37 : vector<16x128xf32>
    %c2_42 = arith.constant 2 : index
    %c0_43 = arith.constant 0 : index
    %39 = vector.load %arg8[%c2_42, %c0_43] : memref<18x128xf32, #tpu.memory_space<vmem>>, vector<16x128xf32>
    %c2_44 = arith.constant 2 : index
    %c0_45 = arith.constant 0 : index
    %c0_46 = arith.constant 0 : index
    %40 = vector.load %arg3[%c2_44, %c0_45, %c0_46] : memref<3x128x128xf32, #tpu.memory_space<vmem>>, vector<1x128x128xf32>
    %41 = vector.shape_cast %40 : vector<1x128x128xf32> to vector<128x128xf32>
    %cst_47 = arith.constant dense<0.000000e+00> : vector<16x128xf32>
    %42 = tpu.matmul %39, %41, %cst_47 {dimension_numbers = #tpu.dot_dimension_numbers<[1], [0], [0], [1], [0, 0, 1, 1], [], []>} : vector<16x128xf32>, vector<128x128xf32>, vector<16x128xf32> -> vector<16x128xf32>
    %43 = arith.addf %38, %42 : vector<16x128xf32>
    %cst_48 = arith.constant 0.000000e+00 : f32
    %44 = vector.broadcast %cst_48 : f32 to vector<16x128xf32>
    %45 = arith.maximumf %43, %44 : vector<16x128xf32>
    %c0_49 = arith.constant 0 : index
    %c0_50 = arith.constant 0 : index
    %c0_51 = arith.constant 0 : index
    %46 = vector.load %arg6[%c0_49, %c0_50, %c0_51] : memref<1x16x128xf32, #tpu.memory_space<vmem>>, vector<1x16x128xf32>
    %47 = vector.shape_cast %46 : vector<1x16x128xf32> to vector<16x128xf32>
    %48 = vector.shape_cast %45 : vector<16x128xf32> to vector<1x16x128xf32>
    tpu.vector_store %arg6[%c0_49, %c0_50, %c0_51], %48 {strides = array<i32>} : memref<1x16x128xf32, #tpu.memory_space<vmem>>, vector<1x16x128xf32>,
    return
  }
  func.func @transform_0(%arg0: i32) -> (i32, i32, i32) {
    %c0_i32 = arith.constant 0 : i32
    %c0_i32_0 = arith.constant 0 : i32
    %c0_i32_1 = arith.constant 0 : i32
    return %arg0, %c0_i32, %c0_i32_0 : i32, i32, i32
  }
  func.func @transform_1(%arg0: i32) -> (i32, i32, i32) {
    %c0_i32 = arith.constant 0 : i32
    %c0_i32_0 = arith.constant 0 : i32
    %c0_i32_1 = arith.constant 0 : i32
    %c0_i32_2 = arith.constant 0 : i32
    return %c0_i32, %c0_i32_0, %c0_i32_1 : i32, i32, i32
  }
  func.func @transform_2(%arg0: i32) -> (i32, i32, i32) {
    %c0_i32 = arith.constant 0 : i32
    %c0_i32_0 = arith.constant 0 : i32
    %c0_i32_1 = arith.constant 0 : i32
    %c0_i32_2 = arith.constant 0 : i32
    return %c0_i32, %c0_i32_0, %c0_i32_1 : i32, i32, i32
  }
  func.func @transform_3(%arg0: i32) -> (i32, i32) {
    %c0_i32 = arith.constant 0 : i32
    %c0_i32_0 = arith.constant 0 : i32
    %c0_i32_1 = arith.constant 0 : i32
    return %c0_i32, %c0_i32_0 : i32, i32
  }
  func.func @transform_4(%arg0: i32) -> (i32, i32) {
    %c0_i32 = arith.constant 0 : i32
    %c0_i32_0 = arith.constant 0 : i32
    %c0_i32_1 = arith.constant 0 : i32
    return %c0_i32, %c0_i32_0 : i32, i32
  }
  func.func @transform_5(%arg0: i32) -> (i32, i32, i32) {
    %c0_i32 = arith.constant 0 : i32
    %c0_i32_0 = arith.constant 0 : i32
    %c0_i32_1 = arith.constant 0 : i32
    return %arg0, %c0_i32, %c0_i32_0 : i32, i32, i32
  }
}

</mosaic_0001>

<bundles_post_ra>
// kernel: tpu_custom_call.1
= control target key start
LH: loop header
LB: loop body
LE: loop exit
PB: predicated region body
PF: predicated region fallthrough
CT: control target
= control target key end

     0   :  { %10 = vsyncpa [#allocation5], 0  ;;  %s1798_s0 = inlined_call_operand.hbm [shape: f32[2,16,128], index: 0, kind: input, shape index: {}]   ;;  %s1799_s1 = inlined_call_operand.hbm [shape: f32[3,128,128], index: 1, kind: input, shape index: {}]   ;;  %s1800_s2 = inlined_call_operand.hbm [shape: f32[3,128,128], index: 2, kind: input, shape index: {}]   ;;  %s1801_s3 = inlined_call_operand.vmem [shape: f32[1,128], index: 3, kind: input, shape index: {}]   ;;  %s1802_s4 = inlined_call_operand.vmem [shape: f32[1,128], index: 4, kind: input, shape index: {}]   ;;  %s1803_s5 = inlined_call_operand.hbm [shape: f32[2,16,128], index: 5, kind: output, shape index: {}]  }
   0x1   :  { %12 = vsyncpa [#allocation5 + $0x1], 0 }
   0x2   :  { %13 = vsyncpa [#allocation8], 0 }
   0x3   :  { %14 = vsyncpa [#allocation6], 0 }
   0x4   :  { %16 = vsyncpa [#allocation6 + $0x1], 0  ;;  %s1577_s18 = smov 0   ;;  %s1579_s19 = smov 0  }
   0x5   :  { %s1581_s20 = smov 0   ;;  %s1583_s21 = smov 0  }
   0x6 LB: > { %s1598_s22 = sadd.s32 4294967295, %s1536_s21   ;;  %s976_s23 = sadd.s32 4294967294, %s1536_s21   ;;  %s1536_s21 = sphi %s1583_s21, %s1826_s21   ;;  %s1532_s20 = sphi %s1581_s20, %s1825_s20   ;;  %s1528_s19 = sphi %s1579_s19, %s1824_s19   ;;  %s1524_s18 = sphi %s1577_s18, %s1823_s18  }
   0x7   : > { %p42_p0 = scmp.ne.s32.totalorder %s1528_s19, %s1524_s18  ;;  %p1804_p1 = scmp.eq.s32.totalorder %s1598_s22, 0 }
   0x8   : > { %p150_p2 = scmp.eq.s32.totalorder %s1598_s22, 1  ;;  %p156_p3 = scmp.eq.s32.totalorder %s976_s23, 1 }
   0x9   : > { %p1607_p4 = por %p1804_p1, %p42_p0  ;;  %p977_p5 = scmp.ge.s32.totalorder %s1536_s21, 1 }
   0xa   : > { %p1612_p6 = por %p156_p3, %p42_p0  ;;  %p163_p7 = scmp.lt.s32.totalorder %s1536_s21, 3 }
   0xb   : > { %s1809_s24 = scalar_select %p1607_p4, 1, 0 }
   0xc   : > { %s1810_s25 = scalar_select %p1612_p6, 1, 0 }
   0xd   : > { %p1617_p8 = pnand %p977_p5, %p163_p7  ;;  %s1538_s27 = smov [#allocation7]  }
   0xe   : > { %s175_s28 = sshll.u32 %s1538_s27, 4  ;;  %s1539_s30 = smov [#allocation9]   ;;  %s176_s28 = int_to_ptr.vmem [resolvable:$true] %s175_s28 }
   0xf   : > { %s1811_s26 = scalar_select %p1617_p8, 1, 0 }
  0x10   : > { %p1328_p9 = pneg %p1617_p8  ;;  %s188_s6 = sshll.u32 %s1539_s30, 4  ;;  %s189_s6 = int_to_ptr.vmem [resolvable:$true] %s188_s6 }
  0x11   : > { %s1399_s7 = scalar_lea.vmem %s176_s28, 6144  ;;  %p1407_p5 = scmp.lt.s32.totalorder %s176_s28, %s176_s28 }
  0x12   : > { %p1626_p11 = pnand %p1328_p9, %p1804_p1  ;;  %p1400_p13 = scmp.ne.s32.totalorder %s176_s28, %s1399_s7 }
  0x13   : > { %p1408_p7 = scmp.lt.s32.totalorder %s1399_s7, %s1399_s7 }
  0x14   : > { %p1390_p12 = pneg %p1626_p11 }
  0x15   : > { %p1409_p10 = por %p1408_p7, %p1407_p5 }
  0x16   : > { %p1402_p0 = pnand %p1400_p13, %p1390_p12 }
  0x18   : > { %p1403_p3 = pneg %p1402_p0 }
  0x1a   : > { %p1410_p9 = pnand %p1409_p10, %p1403_p3 }
  0x1c   : > { %1413 = shalt.err (!%p1410_p9)
}
  0x1d   : > { %s1805_s8 = smov 128   ;;  %s1541_s9 = smov 8  }
  0x1e   : > { %1331 = dma.hbm_to_vmem [thread:$0]  (!%p1626_p11), %s1799_s1, 6144, %s176_s28, [#allocation8], %s1805_s8, %s1805_s8, %s1541_s9  }
  0x1f   : > { %s1425_s12 = scalar_lea.vmem %s189_s6, 6144  ;;  %p1433_p10 = scmp.lt.s32.totalorder %s189_s6, %s189_s6 }
  0x20   : > { %p1426_p13 = scmp.ne.s32.totalorder %s189_s6, %s1425_s12  ;;  %p1434_p3 = scmp.lt.s32.totalorder %s1425_s12, %s1425_s12 }
  0x22   : > { %p1428_p0 = pnand %p1426_p13, %p1390_p12  ;;  %p1435_p7 = por %p1434_p3, %p1433_p10 }
  0x24   : > { %p1429_p5 = pneg %p1428_p0 }
  0x26   : > { %p1436_p9 = pnand %p1435_p7, %p1429_p5 }
  0x28   : > { %1439 = shalt.err (!%p1436_p9)
}
  0x29   : > { %1334 = dma.hbm_to_vmem [thread:$0]  (!%p1626_p11), %s1800_s2, 6144, %s189_s6, [#allocation8], %s1805_s8, %s1805_s8, %s1541_s9  }
  0x2a   : > { %s1655_s15 = sadd.s32 1, %s1536_s21   ;;  %s29_s16 = sadd.s32 1, %s1532_s20 }
  0x2b   : > { %s26_s17 = ssub.s32 %s1536_s21, %s1655_s15  ;;  %p36_p12 = scmp.ne.s32.totalorder %s1532_s20, %s1528_s19 }
  0x2c   : > { %p27_p13 = scmp.eq.s32.totalorder %s26_s17, 0  ;;  %p37_p0 = scmp.eq.s32.totalorder %s1536_s21, 0 }
  0x2d   : > { %p1665_p5 = por %p150_p2, %p36_p12  ;;  %p1345_p10 = scmp.lt.s32.totalorder %s1536_s21, 2 }
  0x2e   : > { %s1671_s27 = scalar_select %p27_p13, %s1532_s20, %s29_s16  }
  0x2f   : > { %s1813_s23 = scalar_select %p1665_p5, 1, 0 }
  0x30   : > { %p38_p3 = por %p37_p0, %p36_p12  ;;  %s208_s28 = sand.u32 1, %s1532_s20  }
  0x31   : > { %s981_s29 = sshll.u32 %s208_s28, 4  ;;  %s996_s30 = sshll.u32 %s1536_s21, 8 }
  0x32   : > { %s1678_s10 = scalar_lea.hbm %s1798_s0, %s996_s30  ;;  %s212_s11 = scalar_lea.vmem [#allocation4], %s981_s29 }
  0x33   : > { %s219_s12 = sshll.u32 %s212_s11, 4  ;;  %p1682_p2 = pnand %p1345_p10, %p38_p3  ;;  %s1680_s12 = int_to_ptr.vmem [resolvable:$true] %s219_s12 }
  0x34   : > { %s1686_s14 = scalar_lea.sflag [#allocation5], %s208_s28  ;;  %s1440_s16 = scalar_lea.hbm %s1678_s10, 256 }
  0x35   : > { %p1441_p11 = scmp.ne.s32.totalorder %s1678_s10, %s1440_s16  ;;  %p1442_p7 = pneg %p1682_p2 }
  0x36   : > { %s1445_s29 = scalar_lea.hbm %s1798_s0, 512  ;;  %p1446_p13 = scmp.lt.s32.totalorder %s1678_s10, %s1798_s0 }
  0x37   : > { %p1443_p9 = pnand %p1442_p7, %p1441_p11  ;;  %p1447_p0 = scmp.lt.s32.totalorder %s1445_s29, %s1440_s16 }
  0x39   : > { %p1444_p12 = pneg %p1443_p9  ;;  %p1448_p10 = por %p1447_p0, %p1446_p13 }
  0x3b   : > { %p1449_p3 = pnand %p1448_p10, %p1444_p12 }
  0x3d   : > { %1452 = shalt.err (!%p1449_p3)
}
  0x3e   : > { %s1453_s28 = scalar_lea.vmem %s1680_s12, 256  ;;  %s1542_s11 = smov [#allocation4]  }
  0x3f   : > { %p1454_p1 = scmp.ne.s32.totalorder %s1680_s12, %s1453_s28  ;;  %s1458_s8 = sshll.u32 %s1542_s11, 4  ;;  %s1459_s8 = int_to_ptr.vmem [resolvable:$false] %s1458_s8 }
  0x40   : > { %s1460_s17 = scalar_lea.vmem %s1459_s8, 512  ;;  %p1461_p9 = scmp.lt.s32.totalorder %s1680_s12, %s1459_s8 }
  0x41   : > { %p1456_p6 = pnand %p1454_p1, %p1442_p7  ;;  %p1462_p5 = scmp.lt.s32.totalorder %s1460_s17, %s1453_s28 }
  0x43   : > { %p1457_p11 = pneg %p1456_p6  ;;  %p1463_p4 = por %p1462_p5, %p1461_p9 }
  0x45   : > { %p1464_p8 = pnand %p1463_p4, %p1457_p11 }
  0x47   : > { %1467 = shalt.err (!%p1464_p8)
}
  0x48   : > { %s1815_s16 = smov 128   ;;  %p1816_p1 = scmp.ne.s32.totalorder %s1811_s26, 0 }
  0x49   : > { %1338 = dma.hbm_to_vmem [thread:$0]  (!%p1682_p2), %s1678_s10, 256, %s1680_s12, %s1686_s14, %s1815_s16, %s1815_s16, %s1541_s9  }
  0x4a   : > { %231 = sbr.rel (%p1816_p1) target bundleno = 594 (0x252), region = 40  ;;  %s1713_s30 = sand.u32 (!%p1816_p1), 1, %s1528_s19  }
  0x4b   : > { %s985_s8 = sshll.u32 (!%p1816_p1), %s1713_s30, 4  ;;  %s234_s29 = scalar_lea.sflag (!%p1816_p1), [#allocation5], %s1713_s30 }
  0x4c   : > { %s1719_s13 = scalar_lea.vmem (!%p1816_p1), [#allocation4], %s985_s8  ;;  %p1817_p4 = scmp.ne.s32.totalorder (!%p1816_p1), %s1809_s24, 0 }
  0x4f   : > { %1511 = dma.done.wait (%p1817_p4), %s234_s29, 256  }
  0x50   : > { %1513 = vsyncadd (%p1817_p4), %s234_s29, 4294967040  ;;  %p1818_p6 = scmp.eq.s32.totalorder %s1598_s22, 0 }
  0x52   : > { %1515 = dma.done.wait (%p1818_p6), [#allocation8], 12288   ;;  %p1819_p8 = pmov %p1818_p6 }
  0x53   : > { %v1543_v0 = vmov 0.0   ;;  %v294_v1 = vld [vmem:[#allocation7 + $0xf8] sm:$0xff]  ;;  %v293_v2 = vld [vmem:[#allocation7 + $0xf0] sm:$0xff]  ;;  %v292_v5 = vld [vmem:[#allocation7 + $0xe8] sm:$0xff]  ;;  %s271_s12 = scalar_lea.vmem [#allocation10], %s985_s8  ;;  %s997_s6 = sshll.u32 %s1598_s22, 8 }
  0x54   : > { %1517 = vsyncadd (%p1819_p8), [#allocation8], 4294955008  ;;  %274 = vst [vmem:[#allocation2] sm:$0x1] %v1543_v0  ;;  %v394_v3 = vld [vmem:[#allocation7 + $0x78] sm:$0xff]  ;;  %1106 = vmatprep.subr.mxu0 %v294_v1  ;;  %v393_v4 = vld [vmem:[#allocation7 + $0x70] sm:$0xff]  ;;  %s1755_s11 = scalar_lea.hbm %s1803_s5, %s997_s6 }
  0x55   : > { %275 = vst [vmem:[#allocation2 + $0x11] sm:$0x1] %v1543_v0  ;;  %570 = vst [vmem:[#allocation3] sm:$0x1] %v1543_v0  ;;  %1141 = vmatprep.subr.mxu1 %v394_v3  ;;  %1107 = vmatpush3.msra.mxu0 %v294_v1  ;;  %v392_v6 = vld [vmem:[#allocation7 + $0x68] sm:$0xff]  ;;  %v291_v7 = vld [vmem:[#allocation7 + $0xe0] sm:$0xff] }
  0x56   : > { %571 = vst [vmem:[#allocation3 + $0x11] sm:$0x1] %v1543_v0  ;;  %1142 = vmatpush3.msra.mxu1 %v394_v3  ;;  %1108 = vmatprep.subr.mxu0 %v293_v2  ;;  %v391_v8 = vld [vmem:[#allocation7 + $0x60] sm:$0xff]  ;;  %v290_v9 = vld [vmem:[#allocation7 + $0xd8] sm:$0xff]  ;;  %v289_v11 = vld [vmem:[#allocation7 + $0xd0] sm:$0xff]  ;;  %s884_s14 = sshll.u32 %s271_s12, 4  ;;  %s1750_s14 = int_to_ptr.vmem [resolvable:$true] %s884_s14 }
  0x57   : > { %1143 = vmatprep.subr.mxu1 %v393_v4  ;;  %1109 = vmatpush3.msra.mxu0 %v293_v2  ;;  %v390_v10 = vld [vmem:[#allocation7 + $0x58] sm:$0xff]  ;;  %v389_v12 = vld [vmem:[#allocation7 + $0x50] sm:$0xff]  ;;  %v288_v13 = vld [vmem:[#allocation7 + $0xc8] sm:$0xff]  ;;  %s871_s17 = scalar_lea.sflag [#allocation6], %s1713_s30  ;;  %s1468_s16 = scalar_lea.vmem %s1750_s14, 256 }
  0x58   : > { %1144 = vmatpush3.msra.mxu1 %v393_v4  ;;  %1110 = vmatprep.subr.mxu0 %v292_v5  ;;  %v388_v14 = vld [vmem:[#allocation7 + $0x48] sm:$0xff]  ;;  %v1730_v15 = vld [vmem:[%s1719_s13] sm:$0xff]  ;;  %v286_v19 = vld [vmem:[#allocation7 + $0xb8] sm:$0xff]  ;;  %p1469_p5 = scmp.ne.s32.totalorder %s1750_s14, %s1468_s16  ;;  %p1820_p2 = scmp.ne.s32.totalorder %s1813_s23, 0 }
  0x59   : > { %1145 = vmatprep.subr.mxu1 %v392_v6  ;;  %1111 = vmatpush3.msra.mxu0 %v292_v5  ;;  %v1733_v16 = vld [vmem:[%s1719_s13 + $0x8] sm:$0xff]  ;;  %276 = vst [vmem:[#allocation2 + $0x1] sm:$0xff] %v1730_v15  ;;  %v287_v17 = vld [vmem:[#allocation7 + $0xc0] sm:$0xff]  ;;  %v285_v21 = vld [vmem:[#allocation7 + $0xb0] sm:$0xff]  ;;  %s1544_s22 = smov [#allocation10]  }
  0x5a   : > { %1146 = vmatpush3.msra.mxu1 %v392_v6  ;;  %1112 = vmatprep.subr.mxu0 %v291_v7  ;;  %277 = vst [vmem:[#allocation2 + $0x9] sm:$0xff] %v1733_v16  ;;  %v387_v18 = vld [vmem:[#allocation7 + $0x40] sm:$0xff]  ;;  %v386_v20 = vld [vmem:[#allocation7 + $0x38] sm:$0xff]  ;;  %v385_v22 = vld [vmem:[#allocation7 + $0x30] sm:$0xff]  ;;  %p1470_p7 = pnand %p1469_p5, %p1820_p2  ;;  %s1472_s8 = sshll.u32 %s1544_s22, 4  ;;  %s1473_s8 = int_to_ptr.vmem [resolvable:$false] %s1472_s8 }
  0x5b   : > { %1147 = vmatprep.subr.mxu1 %v391_v8  ;;  %1113 = vmatpush3.msra.mxu0 %v291_v7  ;;  %v284_v23 = vld [vmem:[#allocation7 + $0xa8] sm:$0xff]  ;;  %v283_v25 = vld [vmem:[#allocation7 + $0xa0] sm:$0xff]  ;;  %v282_v27 = vld [vmem:[#allocation7 + $0x98] sm:$0xff]  ;;  %s1474_s29 = scalar_lea.vmem %s1473_s8, 512  ;;  %p1475_p13 = scmp.lt.s32.totalorder %s1750_s14, %s1473_s8 }
  0x5c   : > { %1148 = vmatpush3.msra.mxu1 %v391_v8  ;;  %1114 = vmatprep.subr.mxu0 %v290_v9  ;;  %v384_v24 = vld [vmem:[#allocation7 + $0x28] sm:$0xff]  ;;  %v383_v26 = vld [vmem:[#allocation7 + $0x20] sm:$0xff]  ;;  %v382_v28 = vld [vmem:[#allocation7 + $0x18] sm:$0xff]  ;;  %p1471_p12 = pneg %p1470_p7  ;;  %p1476_p0 = scmp.lt.s32.totalorder %s1474_s29, %s1468_s16 }
  0x5d   : > { %1149 = vmatprep.subr.mxu1 %v390_v10  ;;  %1115 = vmatpush3.msra.mxu0 %v290_v9  ;;  %v281_v29 = vld [vmem:[#allocation7 + $0x90] sm:$0xff]  ;;  %v280_v31 = vld [vmem:[#allocation7 + $0x88] sm:$0xff]  ;;  %v279_v33 = vld [vmem:[#allocation7 + $0x80] sm:$0xff] }
  0x5e   : > { %1150 = vmatpush3.msra.mxu1 %v390_v10  ;;  %1116 = vmatprep.subr.mxu0 %v289_v11  ;;  %v381_v30 = vld [vmem:[#allocation7 + $0x10] sm:$0xff]  ;;  %v380_v32 = vld [vmem:[#allocation7 + $0x8] sm:$0xff]  ;;  %v379_v34 = vld [vmem:[#allocation7] sm:$0xff]  ;;  %p1477_p10 = por %p1476_p0, %p1475_p13 }
  0x5f   : > { %1151 = vmatprep.subr.mxu1 %v389_v12  ;;  %1117 = vmatpush3.msra.mxu0 %v289_v11  ;;  %v490_v35 = vld [vmem:[#allocation7 + $0x178] sm:$0xff]  ;;  %v489_v38 = vld [vmem:[#allocation7 + $0x170] sm:$0xff]  ;;  %v488_v40 = vld [vmem:[#allocation7 + $0x168] sm:$0xff] }
  0x60   : > { %1152 = vmatpush3.msra.mxu1 %v389_v12  ;;  %1118 = vmatprep.subr.mxu0 %v288_v13  ;;  %v377_v36 = vld [vmem:[#allocation2] sm:$0xff]  ;;  %v487_v41 = vld [vmem:[#allocation7 + $0x160] sm:$0xff]  ;;  %v486_v42 = vld [vmem:[#allocation7 + $0x158] sm:$0xff]  ;;  %p1478_p3 = pnand %p1477_p10, %p1471_p12 }
  0x61   : > { %1153 = vmatprep.subr.mxu1 %v388_v14  ;;  %1119 = vmatpush3.msra.mxu0 %v288_v13  ;;  %v378_v37 = vld [vmem:[#allocation2 + $0x8] sm:$0xff]  ;;  %v485_v43 = vld [vmem:[#allocation7 + $0x150] sm:$0xff]  ;;  %v484_v44 = vld [vmem:[#allocation7 + $0x148] sm:$0xff] }
  0x62   : > { %1154 = vmatpush3.msra.mxu1 %v388_v14  ;;  %1120 = vmatprep.subr.mxu0 %v287_v17  ;;  %v472_v39 = vld [vmem:[#allocation2 + $0x2] sm:$0xff]  ;;  %v483_v45 = vld [vmem:[#allocation7 + $0x140] sm:$0xff]  ;;  %v480_v48 = vld [vmem:[#allocation7 + $0x128] sm:$0xff] }
  0x63   : > { %1155 = vmatprep.subr.mxu1 %v387_v18  ;;  %1121 = vmatpush3.msra.mxu0 %v287_v17  ;;  %v482_v46 = vld [vmem:[#allocation7 + $0x138] sm:$0xff]  ;;  %v481_v47 = vld [vmem:[#allocation7 + $0x130] sm:$0xff]  ;;  %v479_v49 = vld [vmem:[#allocation7 + $0x120] sm:$0xff] }
  0x64   : > { %1156 = vmatpush3.msra.mxu1 %v387_v18  ;;  %1122 = vmatprep.subr.mxu0 %v286_v19  ;;  %v478_v50 = vld [vmem:[#allocation7 + $0x118] sm:$0xff]  ;;  %v477_v51 = vld [vmem:[#allocation7 + $0x110] sm:$0xff]  ;;  %v476_v52 = vld [vmem:[#allocation7 + $0x108] sm:$0xff] }
  0x65   : > { %1157 = vmatprep.subr.mxu1 %v386_v20  ;;  %1123 = vmatpush3.msra.mxu0 %v286_v19  ;;  %v475_v53 = vld [vmem:[#allocation7 + $0x100] sm:$0xff]  ;;  %v590_v55 = vld [vmem:[#allocation9 + $0xf8] sm:$0xff]  ;;  %v589_v56 = vld [vmem:[#allocation9 + $0xf0] sm:$0xff] }
  0x66   : > { %1158 = vmatpush3.msra.mxu1 %v386_v20  ;;  %1124 = vmatprep.subr.mxu0 %v285_v21  ;;  %v473_v54 = vld [vmem:[#allocation2 + $0xa] sm:$0xff]  ;;  %v588_v58 = vld [vmem:[#allocation9 + $0xe8] sm:$0xff]  ;;  %v691_v59 = vld [vmem:[#allocation9 + $0x70] sm:$0xff] }
  0x67   : > { %1159 = vmatprep.subr.mxu1 %v385_v22  ;;  %1125 = vmatpush3.msra.mxu0 %v285_v21  ;;  %v692_v57 = vld [vmem:[#allocation9 + $0x78] sm:$0xff]  ;;  %v690_v60 = vld [vmem:[#allocation9 + $0x68] sm:$0xff]  ;;  %v587_v61 = vld [vmem:[#allocation9 + $0xe0] sm:$0xff] }
  0x68   : > { %1160 = vmatpush3.msra.mxu1 %v385_v22  ;;  %1126 = vmatprep.subr.mxu0 %v284_v23  ;;  %v689_v62 = vld [vmem:[#allocation9 + $0x60] sm:$0xff]  ;;  %v586_v63 = vld [vmem:[#allocation9 + $0xd8] sm:$0xff]  ;;  %v585_v1 = vld [vmem:[#allocation9 + $0xd0] sm:$0xff] }
  0x69   : > { %1161 = vmatprep.subr.mxu1 %v384_v24  ;;  %1127 = vmatpush3.msra.mxu0 %v284_v23  ;;  %v688_v0 = vld [vmem:[#allocation9 + $0x58] sm:$0xff]  ;;  %v687_v2 = vld [vmem:[#allocation9 + $0x50] sm:$0xff]  ;;  %v584_v3 = vld [vmem:[#allocation9 + $0xc8] sm:$0xff] }
  0x6a   : > { %1162 = vmatpush3.msra.mxu1 %v384_v24  ;;  %1128 = vmatprep.subr.mxu0 %v283_v25  ;;  %v686_v4 = vld [vmem:[#allocation9 + $0x48] sm:$0xff]  ;;  %v583_v5 = vld [vmem:[#allocation9 + $0xc0] sm:$0xff]  ;;  %v582_v7 = vld [vmem:[#allocation9 + $0xb8] sm:$0xff] }
  0x6b   : > { %1163 = vmatprep.subr.mxu1 %v383_v26  ;;  %1129 = vmatpush3.msra.mxu0 %v283_v25  ;;  %v685_v6 = vld [vmem:[#allocation9 + $0x40] sm:$0xff]  ;;  %v581_v8 = vld [vmem:[#allocation9 + $0xb0] sm:$0xff]  ;;  %v580_v9 = vld [vmem:[#allocation9 + $0xa8] sm:$0xff] }
  0x6c   : > { %1164 = vmatpush3.msra.mxu1 %v383_v26  ;;  %1130 = vmatprep.subr.mxu0 %v282_v27  ;;  %v579_v10 = vld [vmem:[#allocation9 + $0xa0] sm:$0xff]  ;;  %v578_v11 = vld [vmem:[#allocation9 + $0x98] sm:$0xff]  ;;  %v577_v13 = vld [vmem:[#allocation9 + $0x90] sm:$0xff] }
  0x6d   : > { %1165 = vmatprep.subr.mxu1 %v382_v28  ;;  %1131 = vmatpush3.msra.mxu0 %v282_v27  ;;  %v684_v12 = vld [vmem:[#allocation9 + $0x38] sm:$0xff]  ;;  %v683_v14 = vld [vmem:[#allocation9 + $0x30] sm:$0xff]  ;;  %v576_v17 = vld [vmem:[#allocation9 + $0x88] sm:$0xff] }
  0x6e   : > { %1166 = vmatpush3.msra.mxu1 %v382_v28  ;;  %1132 = vmatprep.subr.mxu0 %v281_v29  ;;  %v682_v18 = vld [vmem:[#allocation9 + $0x28] sm:$0xff]  ;;  %v575_v19 = vld [vmem:[#allocation9 + $0x80] sm:$0xff]  ;;  %v788_v21 = vld [vmem:[#allocation9 + $0x178] sm:$0xff] }
  0x6f   : > { %1167 = vmatprep.subr.mxu1 %v381_v30  ;;  %1133 = vmatpush3.msra.mxu0 %v281_v29  ;;  %v681_v20 = vld [vmem:[#allocation9 + $0x20] sm:$0xff]  ;;  %v680_v22 = vld [vmem:[#allocation9 + $0x18] sm:$0xff]  ;;  %v679_v23 = vld [vmem:[#allocation9 + $0x10] sm:$0xff] }
  0x70   : > { %1168 = vmatpush3.msra.mxu1 %v381_v30  ;;  %1134 = vmatprep.subr.mxu0 %v280_v31  ;;  %v678_v24 = vld [vmem:[#allocation9 + $0x8] sm:$0xff]  ;;  %v677_v25 = vld [vmem:[#allocation9] sm:$0xff]  ;;  %v989_v27 = vld [vmem:[%s1801_s3] ss:$0 sm:$0xff] }
  0x71   : > { %1169 = vmatprep.subr.mxu1 %v380_v32  ;;  %1135 = vmatpush3.msra.mxu0 %v280_v31 }
  0x72   : > { %1138 = vmatprep.mubr.f32.mxu0 %v1730_v15  ;;  %1136 = vmatprep.subr.mxu0 %v279_v33 }
  0x73   : > { %1170 = vmatpush3.msra.mxu1 %v380_v32  ;;  %1137 = vmatpush3.msra.mxu0 %v279_v33 }
  0x74   : > { %1171 = vmatprep.subr.mxu1 %v379_v34  ;;  %1139 = vmatmul.mubr.f32.vlgmr.msra.gmra.mxu0 %v1733_v16 }
  0x75   : > { %1176 = vmatprep.subr.mxu0 %v490_v35  ;;  %1172 = vmatpush3.msra.mxu1 %v379_v34 }
  0x76   : > { %1173 = vmatprep.mubr.f32.mxu1 %v377_v36  ;;  %1177 = vmatpush3.msra.mxu0 %v490_v35 }
  0x77   : > { %1174 = vmatmul.mubr.f32.vlgmr.msra.gmra.mxu1 %v378_v37  ;;  %1178 = vmatprep.subr.mxu0 %v489_v38 }
  0x78   : > { %1208 = vmatprep.mubr.f32.mxu0 %v472_v39  ;;  %1179 = vmatpush3.msra.mxu0 %v489_v38 }
  0x79   : > { %1180 = vmatprep.subr.mxu0 %v488_v40  ;;  %1211 = vmatprep.subr.mxu1 %v590_v55 }
  0x7a   : > { %1181 = vmatpush3.msra.mxu0 %v488_v40  ;;  %1212 = vmatpush3.msra.mxu1 %v590_v55  ;;  %v776_v55 = vld [vmem:[#allocation9 + $0x118] sm:$0xff] }
  0x7b   : > { %1182 = vmatprep.subr.mxu0 %v487_v41  ;;  %1213 = vmatprep.subr.mxu1 %v589_v56 }
  0x7c   : > { %1183 = vmatpush3.msra.mxu0 %v487_v41  ;;  %1214 = vmatpush3.msra.mxu1 %v589_v56  ;;  %v787_v41 = vld [vmem:[#allocation9 + $0x170] sm:$0xff] }
  0x7d   : > { %1184 = vmatprep.subr.mxu0 %v486_v42  ;;  %1215 = vmatprep.subr.mxu1 %v588_v58  ;;  %v775_v56 = vld [vmem:[#allocation9 + $0x110] sm:$0xff] }
  0x7e   : > { %1185 = vmatpush3.msra.mxu0 %v486_v42  ;;  %1216 = vmatpush3.msra.mxu1 %v588_v58  ;;  %v786_v42 = vld [vmem:[#allocation9 + $0x168] sm:$0xff]  ;;  %v773_v58 = vld [vmem:[#allocation9 + $0x100] sm:$0xff] }
  0x7f   : > { %1186 = vmatprep.subr.mxu0 %v485_v43  ;;  %1217 = vmatprep.subr.mxu1 %v587_v61 }
  0x80   : > { %1187 = vmatpush3.msra.mxu0 %v485_v43  ;;  %1218 = vmatpush3.msra.mxu1 %v587_v61  ;;  %v785_v43 = vld [vmem:[#allocation9 + $0x160] sm:$0xff] }
  0x81   : > { %1188 = vmatprep.subr.mxu0 %v484_v44  ;;  %1219 = vmatprep.subr.mxu1 %v586_v63 }
  0x82   : > { %1189 = vmatpush3.msra.mxu0 %v484_v44  ;;  %1220 = vmatpush3.msra.mxu1 %v586_v63  ;;  %v784_v44 = vld [vmem:[#allocation9 + $0x158] sm:$0xff] }
  0x83   : > { %1190 = vmatprep.subr.mxu0 %v483_v45  ;;  %1221 = vmatprep.subr.mxu1 %v585_v1 }
  0x84   : > { %1191 = vmatpush3.msra.mxu0 %v483_v45  ;;  %1222 = vmatpush3.msra.mxu1 %v585_v1 }
  0x85   : > { %1192 = vmatprep.subr.mxu0 %v482_v46  ;;  %1223 = vmatprep.subr.mxu1 %v584_v3 }
  0x86   : > { %1193 = vmatpush3.msra.mxu0 %v482_v46  ;;  %1224 = vmatpush3.msra.mxu1 %v584_v3 }
  0x87   : > { %1194 = vmatprep.subr.mxu0 %v481_v47  ;;  %1225 = vmatprep.subr.mxu1 %v583_v5 }
  0x88   : > { %1195 = vmatpush3.msra.mxu0 %v481_v47  ;;  %1226 = vmatpush3.msra.mxu1 %v583_v5 }
  0x89   : > { %1196 = vmatprep.subr.mxu0 %v480_v48  ;;  %1227 = vmatprep.subr.mxu1 %v582_v7 }
  0x8a   : > { %1197 = vmatpush3.msra.mxu0 %v480_v48  ;;  %1228 = vmatpush3.msra.mxu1 %v582_v7  ;;  %v783_v48 = vld [vmem:[#allocation9 + $0x150] sm:$0xff] }
  0x8b   : > { %1198 = vmatprep.subr.mxu0 %v479_v49  ;;  %1229 = vmatprep.subr.mxu1 %v581_v8 }
  0x8c   : > { %1199 = vmatpush3.msra.mxu0 %v479_v49  ;;  %1230 = vmatpush3.msra.mxu1 %v581_v8  ;;  %v782_v49 = vld [vmem:[#allocation9 + $0x148] sm:$0xff] }
  0x8d   : > { %1200 = vmatprep.subr.mxu0 %v478_v50  ;;  %1231 = vmatprep.subr.mxu1 %v580_v9 }
  0x8e   : > { %1201 = vmatpush3.msra.mxu0 %v478_v50  ;;  %1232 = vmatpush3.msra.mxu1 %v580_v9  ;;  %v781_v50 = vld [vmem:[#allocation9 + $0x140] sm:$0xff] }
  0x8f   : > { %1202 = vmatprep.subr.mxu0 %v477_v51  ;;  %1233 = vmatprep.subr.mxu1 %v579_v10 }
  0x90   : > { %1203 = vmatpush3.msra.mxu0 %v477_v51  ;;  %1234 = vmatpush3.msra.mxu1 %v579_v10  ;;  %v780_v51 = vld [vmem:[#allocation9 + $0x138] sm:$0xff] }
  0x91   : > { %1204 = vmatprep.subr.mxu0 %v476_v52  ;;  %1235 = vmatprep.subr.mxu1 %v578_v11 }
  0x92   : > { %1205 = vmatpush3.msra.mxu0 %v476_v52  ;;  %1236 = vmatpush3.msra.mxu1 %v578_v11  ;;  %v779_v52 = vld [vmem:[#allocation9 + $0x130] sm:$0xff] }
  0x93   : > { %1206 = vmatprep.subr.mxu0 %v475_v53  ;;  %1237 = vmatprep.subr.mxu1 %v577_v13 }
  0x94   : > { %1207 = vmatpush3.msra.mxu0 %v475_v53  ;;  %1238 = vmatpush3.msra.mxu1 %v577_v13  ;;  %v778_v53 = vld [vmem:[#allocation9 + $0x128] sm:$0xff] }
  0x95   : > { %1209 = vmatmul.mubr.f32.vlgmr.msra.gmra.mxu0 %v473_v54  ;;  %1246 = vmatprep.subr.mxu0 %v692_v57  ;;  %v777_v54 = vld [vmem:[#allocation9 + $0x120] sm:$0xff] }
  0x96   : > { %1247 = vmatpush3.msra.mxu0 %v692_v57  ;;  %1239 = vmatprep.subr.mxu1 %v576_v17  ;;  %v774_v57 = vld [vmem:[#allocation9 + $0x108] sm:$0xff] }
  0x97   : > { %1248 = vmatprep.subr.mxu0 %v691_v59  ;;  %1240 = vmatpush3.msra.mxu1 %v576_v17 }
  0x98   : > { %1249 = vmatpush3.msra.mxu0 %v691_v59  ;;  %1241 = vmatprep.subr.mxu1 %v575_v19 }
  0x99   : > { %1250 = vmatprep.subr.mxu0 %v690_v60  ;;  %1242 = vmatpush3.msra.mxu1 %v575_v19 }
  0x9a   : > { %1251 = vmatpush3.msra.mxu0 %v690_v60  ;;  %1281 = vmatprep.subr.mxu1 %v788_v21  ;;  %v990_v60 = vld [vmem:[%s1802_s4] ss:$0 sm:$0xff] }
  0x9b   : > { %1252 = vmatprep.subr.mxu0 %v689_v62 }
  0x9c   : > { %1253 = vmatpush3.msra.mxu0 %v689_v62  ;;  %v599_v62 = vadd.f32 %v990_v60, %v1733_v16 }
  0x9d   : > { %1254 = vmatprep.subr.mxu0 %v688_v0 }
  0x9e   : > { %1255 = vmatpush3.msra.mxu0 %v688_v0  ;;  %v598_v0 = vadd.f32 %v990_v60, %v1730_v15 }
  0x9f   : > { %1256 = vmatprep.subr.mxu0 %v687_v2 }
  0xa0   : > { %1257 = vmatpush3.msra.mxu0 %v687_v2 }
  0xa1   : > { %1258 = vmatprep.subr.mxu0 %v686_v4 }
  0xa2   : > { %1259 = vmatpush3.msra.mxu0 %v686_v4 }
  0xa3   : > { %1260 = vmatprep.subr.mxu0 %v685_v6 }
  0xa4   : > { %1261 = vmatpush3.msra.mxu0 %v685_v6 }
  0xa5   : > { %1262 = vmatprep.subr.mxu0 %v684_v12 }
  0xa6   : > { %1263 = vmatpush3.msra.mxu0 %v684_v12 }
  0xa7   : > { %1264 = vmatprep.subr.mxu0 %v683_v14 }
  0xa8   : > { %1265 = vmatpush3.msra.mxu0 %v683_v14 }
  0xa9   : > { %1266 = vmatprep.subr.mxu0 %v682_v18 }
  0xaa   : > { %1267 = vmatpush3.msra.mxu0 %v682_v18 }
  0xab   : > { %1268 = vmatprep.subr.mxu0 %v681_v20 }
  0xac   : > { %1269 = vmatpush3.msra.mxu0 %v681_v20 }
  0xad   : > { %1270 = vmatprep.subr.mxu0 %v680_v22 }
  0xae   : > { %1271 = vmatpush3.msra.mxu0 %v680_v22 }
  0xaf   : > { %1272 = vmatprep.subr.mxu0 %v679_v23 }
  0xb0   : > { %1273 = vmatpush3.msra.mxu0 %v679_v23 }
  0xb1   : > { %1274 = vmatprep.subr.mxu0 %v678_v24 }
  0xb2   : > { %1275 = vmatpush3.msra.mxu0 %v678_v24 }
  0xb3   : > { %1276 = vmatprep.subr.mxu0 %v677_v25 }
  0xb4   : > { %1277 = vmatpush3.msra.mxu0 %v677_v25 }
 0x134   : > { %v1140_v26 = vpop.f32.mrf.mxu0 }
 0x135   : > { %v374_v30 = vadd.f32 %v1140_v26, %v989_v27 }
 0x136   : > { %v368_v28 = vpop.f32.mrf.mxu0 }
 0x137   : > { %v1175_v29 = vpop.f32.mrf.mxu1  ;;  %v369_v31 = vadd.f32 %v989_v27, %v368_v28 }
 0x138   : > { %v471_v33 = vadd.f32 %v1175_v29, %v374_v30 }
 0x139   : > { %v461_v32 = vpop.f32.mrf.mxu1 }
 0x13a   : > { %v470_v35 = vadd.f32 %v461_v32, %v369_v31 }
 0x155   : > { %v1210_v34 = vpop.f32.mrf.mxu0 }
 0x156   : > { %v567_v36 = vadd.f32 %v1210_v34, %v471_v33 }
 0x157   : > { %v557_v37 = vpop.f32.mrf.mxu0 }
 0x158   : > { %v569_v38 = vmax.f32 %v567_v36, 0.0  ;;  %v566_v39 = vadd.f32 %v557_v37, %v470_v35 }
 0x15a   : > { %573 = vst [vmem:[#allocation3 + $0x9] sm:$0xff] %v569_v38  ;;  %v568_v40 = vmax.f32 %v566_v39, 0.0 }
 0x15c   : > { %572 = vst [vmem:[#allocation3 + $0x1] sm:$0xff] %v568_v40  ;;  %1243 = vmatprep.mubr.f32.mxu1 %v568_v40 }
 0x15d   : > { %1244 = vmatmul.mubr.f32.vlgmr.msra.gmra.mxu1 %v569_v38 }
 0x15e   : > { %1282 = vmatpush3.msra.mxu1 %v788_v21 }
 0x15f   : > { %1283 = vmatprep.subr.mxu1 %v787_v41 }
 0x160   : > { %1284 = vmatpush3.msra.mxu1 %v787_v41 }
 0x161   : > { %1285 = vmatprep.subr.mxu1 %v786_v42  ;;  %v771_v59 = vld [vmem:[#allocation3 + $0xa] sm:$0xff] }
 0x162   : > { %1286 = vmatpush3.msra.mxu1 %v786_v42 }
 0x163   : > { %1287 = vmatprep.subr.mxu1 %v785_v43  ;;  %v675_v45 = vld [vmem:[#allocation3] sm:$0xff]  ;;  %v676_v47 = vld [vmem:[#allocation3 + $0x8] sm:$0xff] }
 0x164   : > { %v770_v46 = vld [vmem:[#allocation3 + $0x2] sm:$0xff]  ;;  %1288 = vmatpush3.msra.mxu1 %v785_v43  ;;  %1278 = vmatprep.mubr.f32.mxu0 %v675_v45 }
 0x165   : > { %1289 = vmatprep.subr.mxu1 %v784_v44  ;;  %1313 = vmatprep.mubr.f32.mxu1 %v770_v46 }
 0x166   : > { %1279 = vmatmul.mubr.f32.vlgmr.msra.gmra.mxu0 %v676_v47  ;;  %1290 = vmatpush3.msra.mxu1 %v784_v44 }
 0x167   : > { %1291 = vmatprep.subr.mxu1 %v783_v48 }
 0x168   : > { %1292 = vmatpush3.msra.mxu1 %v783_v48 }
 0x169   : > { %1293 = vmatprep.subr.mxu1 %v782_v49 }
 0x16a   : > { %1294 = vmatpush3.msra.mxu1 %v782_v49 }
 0x16b   : > { %1295 = vmatprep.subr.mxu1 %v781_v50 }
 0x16c   : > { %1296 = vmatpush3.msra.mxu1 %v781_v50 }
 0x16d   : > { %1297 = vmatprep.subr.mxu1 %v780_v51 }
 0x16e   : > { %1298 = vmatpush3.msra.mxu1 %v780_v51 }
 0x16f   : > { %1299 = vmatprep.subr.mxu1 %v779_v52 }
 0x170   : > { %1300 = vmatpush3.msra.mxu1 %v779_v52 }
 0x171   : > { %1301 = vmatprep.subr.mxu1 %v778_v53 }
 0x172   : > { %1302 = vmatpush3.msra.mxu1 %v778_v53 }
 0x173   : > { %1303 = vmatprep.subr.mxu1 %v777_v54 }
 0x174   : > { %1304 = vmatpush3.msra.mxu1 %v777_v54 }
 0x175   : > { %1305 = vmatprep.subr.mxu1 %v776_v55 }
 0x176   : > { %1306 = vmatpush3.msra.mxu1 %v776_v55 }
 0x177   : > { %1307 = vmatprep.subr.mxu1 %v775_v56 }
 0x178   : > { %1308 = vmatpush3.msra.mxu1 %v775_v56 }
 0x179   : > { %1309 = vmatprep.subr.mxu1 %v774_v57 }
 0x17a   : > { %1310 = vmatpush3.msra.mxu1 %v774_v57 }
 0x17b   : > { %1311 = vmatprep.subr.mxu1 %v773_v58 }
 0x17c   : > { %1312 = vmatpush3.msra.mxu1 %v773_v58 }
 0x17d   : > { %1314 = vmatmul.mubr.f32.vlgmr.msra.gmra.mxu1 %v771_v59 }
 0x21d   : > { %v1245_v61 = vpop.f32.mrf.mxu1 }
 0x21e   : > { %v672_v2 = vadd.f32 %v1245_v61, %v599_v62 }
 0x21f   : > { %v666_v1 = vpop.f32.mrf.mxu1 }
 0x220   : > { %v667_v4 = vadd.f32 %v666_v1, %v598_v0 }
 0x226   : > { %v1280_v63 = vpop.f32.mrf.mxu0 }
 0x227   : > { %v769_v5 = vadd.f32 %v1280_v63, %v672_v2 }
 0x228   : > { %v759_v3 = vpop.f32.mrf.mxu0 }
 0x229   : > { %v768_v7 = vadd.f32 %v759_v3, %v667_v4 }
 0x23d   : > { %v1315_v6 = vpop.f32.mrf.mxu1 }
 0x23e   : > { %v865_v8 = vadd.f32 %v1315_v6, %v769_v5 }
 0x23f   : > { %v855_v9 = vpop.f32.mrf.mxu1 }
 0x240   : > { %v867_v10 = vmax.f32 %v865_v8, 0.0  ;;  %v864_v15 = vadd.f32 %v855_v9, %v768_v7 }
 0x242   : > { %869 = vst [vmem:[%s271_s12 + $0x8] sm:$0xff] %v867_v10  ;;  %v866_v16 = vmax.f32 %v864_v15, 0.0 }
 0x244   : > { %868 = vst [vmem:[%s271_s12] sm:$0xff] %v866_v16 }
 0x245   : > { %1481 = shalt.err (!%p1478_p3)
}
 0x246   : > { %s1482_s13 = scalar_lea.hbm %s1755_s11, 256  ;;  %s1486_s9 = scalar_lea.hbm %s1803_s5, 512 }
 0x247   : > { %p1483_p11 = scmp.ne.s32.totalorder %s1755_s11, %s1482_s13  ;;  %p1487_p4 = scmp.lt.s32.totalorder %s1755_s11, %s1803_s5 }
 0x248   : > { %p1488_p6 = scmp.lt.s32.totalorder %s1486_s9, %s1482_s13 }
 0x249   : > { %p1484_p9 = pnand %p1483_p11, %p1820_p2 }
 0x24a   : > { %p1489_p8 = por %p1488_p6, %p1487_p4 }
 0x24b   : > { %p1485_p1 = pneg %p1484_p9 }
 0x24d   : > { %p1490_p5 = pnand %p1489_p8, %p1485_p1 }
 0x24f   : > { %1493 = shalt.err (!%p1490_p5)
}
 0x250   : > { %s1545_s6 = smov 128   ;;  %s1546_s7 = smov 8  }
 0x251   : > { %1326 = dma.vmem_to_hbm [thread:$0]  (%p1820_p2), %s1750_s14, 256, %s1755_s11, %s871_s17, %s1545_s6, %s1545_s6, %s1546_s7  }
 0x252 PF: > { %s899_s28 = sand.u32 1, %s1524_s18   ;;  %p1821_p7 = scmp.ne.s32.totalorder %s1810_s25, 0 }
 0x253   : > { %p1822_p12 = scmp.ge.s32.totalorder %s1536_s21, 2  ;;  %s900_s16 = scalar_lea.sflag [#allocation6], %s899_s28 }
 0x255   : > { %p1340_p13 = pnand %p1822_p12, %p1821_p7 }
 0x257   : > { %p1341_p0 = pneg %p1340_p13 }
 0x259   : > { %1519 = dma.done.wait (%p1341_p0), %s900_s16, 256  }
 0x25a   : > { %1521 = vsyncadd (%p1341_p0), %s900_s16, 4294967040  ;;  %p19_p10 = scmp.ge.s32.totalorder %s1655_s15, 4   ;;  %s1823_s18 = smov %s1528_s19 }
 0x25b   : > { %s1824_s19 = smov %s1532_s20  ;;  %s1825_s20 = smov %s1671_s27 }
 0x25c   : > { %s1826_s21 = smov %s1655_s15  ;;  %21 = sbr.rel (!%p19_p10) target bundleno = 6 (0x6), region = 97 }
 0x261   :  { %905 = vsyncpa [#allocation5], 1 }
 0x262   :  { %907 = vsyncpa [#allocation5 + $0x1], 1 }
 0x263   :  { %908 = vsyncpa [#allocation8], 1 }
 0x264   :  { %909 = vsyncpa [#allocation6], 1 }
 0x265   :  { %911 = vsyncpa [#allocation6 + $0x1], 1 }

</bundles_post_ra>
